<compile_context>
chip_gen: v7x
topology: tpu7x:2x2x1
jax: 0.10.0
libtpu: 0.0.40
codegen_flags: <defaults>
</compile_context>

<pallas_src>
import functools

import jax
import jax.numpy as jnp
from jax.experimental import pallas as pl
from jax.experimental.pallas import tpu as pltpu


_LANE = 128
_SUBLANE = 8
_VMEM_LIMIT = 32 * 1024 * 1024  # sized for v7x's 64 MiB physical VMEM


def _round_up(x, m):
    return (x + m - 1) // m * m


def _choose_row_tile(m, max_tile=1024):
    """Pick (row_tile, padded_rows).  Prefer a divisor of m (no wrapper pad)."""
    if m <= max_tile:
        mp = _round_up(m, _SUBLANE)
        return mp, mp
    for t in range(max_tile, 127, -_SUBLANE):
        if m % t == 0:
            return t, m
    return max_tile, _round_up(m, max_tile)   # rare fallback: pad rows


def _pad_rows(x, mp):
    m = x.shape[0]
    if mp == m:
        return x
    return jnp.pad(x, ((0, mp - m),) + ((0, 0),) * (x.ndim - 1))


# --------------------------------------------------------------------------
# Kernel 1: timestep encoder (Linear + ReLU), optionally fused with the RNN
# input projection.  Outputs are bf16 (f32 accumulation inside).
# --------------------------------------------------------------------------
def _encode_kernel(x_ref, wts_ref, bts_ref, enc_ref):
    x = x_ref[...].astype(jnp.bfloat16)
    u = jnp.dot(x, wts_ref[...], preferred_element_type=jnp.float32) + bts_ref[...]
    enc_ref[...] = jnp.maximum(u, 0.0).astype(enc_ref.dtype)


def _encode_project_kernel(x_ref, wts_ref, bts_ref, wih_ref, enc_ref, proj_ref):
    x = x_ref[...].astype(jnp.bfloat16)
    u = jnp.dot(x, wts_ref[...], preferred_element_type=jnp.float32) + bts_ref[...]
    u = jnp.maximum(u, 0.0)
    enc_ref[...] = u.astype(enc_ref.dtype)
    proj_ref[...] = jnp.dot(u.astype(jnp.bfloat16), wih_ref[...],
                            preferred_element_type=jnp.float32).astype(proj_ref.dtype)


def encode_only(x2d, w_ts, b_ts, *, max_tile=1024):
    m, c = x2d.shape
    tile, mp = _choose_row_tile(m, max_tile)
    xp = _pad_rows(x2d, mp)
    ts_p = w_ts.shape[1]
    out = pl.pallas_call(
        _encode_kernel,
        out_shape=jax.ShapeDtypeStruct((mp, ts_p), jnp.bfloat16),
        grid_spec=pltpu.PrefetchScalarGridSpec(
            num_scalar_prefetch=0,
            grid=(mp // tile,),
            in_specs=[
                pl.BlockSpec((tile, c), lambda i: (i, 0)),
                pl.BlockSpec(w_ts.shape, lambda i: (0, 0)),
                pl.BlockSpec(b_ts.shape, lambda i: (0, 0)),
            ],
            out_specs=pl.BlockSpec((tile, ts_p), lambda i: (i, 0)),
        ),
        compiler_params=pltpu.CompilerParams(
            dimension_semantics=("parallel",),
            vmem_limit_bytes=_VMEM_LIMIT,
        ),
    )(xp, w_ts, b_ts)
    return out[:m] if mp != m else out


def encode_project(x2d, w_ts, b_ts, w_ih_ts, *, max_tile=1024):
    m, c = x2d.shape
    tile, mp = _choose_row_tile(m, max_tile)
    xp = _pad_rows(x2d, mp)
    ts_p = w_ts.shape[1]
    h_p = w_ih_ts.shape[1]
    enc, proj = pl.pallas_call(
        _encode_project_kernel,
        out_shape=[jax.ShapeDtypeStruct((mp, ts_p), jnp.bfloat16),
                   jax.ShapeDtypeStruct((mp, h_p), jnp.bfloat16)],
        grid_spec=pltpu.PrefetchScalarGridSpec(
            num_scalar_prefetch=0,
            grid=(mp // tile,),
            in_specs=[
                pl.BlockSpec((tile, c), lambda i: (i, 0)),
                pl.BlockSpec(w_ts.shape, lambda i: (0, 0)),
                pl.BlockSpec(b_ts.shape, lambda i: (0, 0)),
                pl.BlockSpec(w_ih_ts.shape, lambda i: (0, 0)),
            ],
            out_specs=[pl.BlockSpec((tile, ts_p), lambda i: (i, 0)),
                       pl.BlockSpec((tile, h_p), lambda i: (i, 0))],
        ),
        compiler_params=pltpu.CompilerParams(
            dimension_semantics=("parallel",),
            vmem_limit_bytes=_VMEM_LIMIT,
        ),
    )(xp, w_ts, b_ts, w_ih_ts)
    if mp != m:
        enc, proj = enc[:m], proj[:m]
    return enc, proj


# --------------------------------------------------------------------------
# Kernel 2: dem bias — (Np, Hp) = dem @ W_ih_dem + b_h, computed once so the
# RNN's serial chain never sees this matmul.  f32 output (tiny tensor).
# --------------------------------------------------------------------------
def _linear_kernel(x_ref, w_ref, b_ref, o_ref):
    x = x_ref[...].astype(jnp.bfloat16)
    o_ref[...] = (jnp.dot(x, w_ref[...], preferred_element_type=jnp.float32)
                  + b_ref[...]).astype(o_ref.dtype)


def dem_bias(dem_p, w_dem, b_h, *, max_tile=1024):
    m, c = dem_p.shape
    tile, mp = _choose_row_tile(m, max_tile)
    xp = _pad_rows(dem_p, mp)
    h_p = w_dem.shape[1]
    out = pl.pallas_call(
        _linear_kernel,
        out_shape=jax.ShapeDtypeStruct((mp, h_p), jnp.float32),
        grid_spec=pltpu.PrefetchScalarGridSpec(
            num_scalar_prefetch=0,
            grid=(mp // tile,),
            in_specs=[
                pl.BlockSpec((tile, c), lambda i: (i, 0)),
                pl.BlockSpec(w_dem.shape, lambda i: (0, 0)),
                pl.BlockSpec(b_h.shape, lambda i: (0, 0)),
            ],
            out_specs=pl.BlockSpec((tile, h_p), lambda i: (i, 0)),
        ),
        compiler_params=pltpu.CompilerParams(
            dimension_semantics=("parallel",),
            vmem_limit_bytes=_VMEM_LIMIT,
        ),
    )(xp, w_dem, b_h)
    return out[:m] if mp != m else out


# --------------------------------------------------------------------------
# Kernel 3: tanh RNN over time chunks, fused predictor head in the epilogue.
# Grid = (batch_tiles [parallel], time_chunks [arbitrary]).  The serial loop
# only does h @ W_hh + xproj[t] + bias; the chunk's hidden block is buffered
# in VMEM scratch, stored once as a dense bf16 slab, and pushed through the
# head matmuls while the recurrence chain stalls the MXU anyway.
# --------------------------------------------------------------------------
def _rnn_recurrence(xproj_ref, bias_ref, whh_ref, h_scr, o_scr, tl):
    @pl.when(pl.program_id(1) == 0)
    def _():
        h_scr[...] = jnp.zeros_like(h_scr)

    bias = bias_ref[...]
    whh = whh_ref[...]
    h = h_scr[...]
    # Static unroll; tl is kept <= 16 so live ranges stay within the 64-vreg
    # file.  TODO(synk): sweep tl / partial-unroll fori_loop if spills appear.
    for tt in range(tl):
        pre = (xproj_ref[:, tt, :].astype(jnp.float32)
               + jnp.dot(h.astype(jnp.bfloat16), whh,
                         preferred_element_type=jnp.float32)
               + bias)
        h = jnp.tanh(pre)
        o_scr[:, tt, :] = h
    h_scr[...] = h
    return o_scr[...]          # (bn, tl, Hp) f32


def _rnn_kernel(xproj_ref, bias_ref, whh_ref, o_ref, h_scr, o_scr, *, tl):
    chunk = _rnn_recurrence(xproj_ref, bias_ref, whh_ref, h_scr, o_scr, tl)
    o_ref[...] = chunk.astype(o_ref.dtype)          # one dense bf16 slab store


def _rnn_mlp_kernel(xproj_ref, bias_ref, whh_ref, w1_ref, b1_ref, w2_ref, b2_ref,
                    o_ref, pred_ref, h_scr, o_scr, *, tl):
    chunk = _rnn_recurrence(xproj_ref, bias_ref, whh_ref, h_scr, o_scr, tl)
    o_ref[...] = chunk.astype(o_ref.dtype)
    bn, tc, hp = chunk.shape
    hflat = chunk.reshape(bn * tc, hp).astype(jnp.bfloat16)
    z = jnp.dot(hflat, w1_ref[...], preferred_element_type=jnp.float32) + b1_ref[...]
    z = jnp.maximum(z, 0.0)
    p = (jnp.dot(z.astype(jnp.bfloat16), w2_ref[...],
                 preferred_element_type=jnp.float32) + b2_ref[...])
    pred_ref[...] = p.reshape(bn, tc, -1).astype(pred_ref.dtype)


def _rnn_lin_kernel(xproj_ref, bias_ref, whh_ref, w1_ref, b1_ref,
                    o_ref, pred_ref, h_scr, o_scr, *, tl):
    chunk = _rnn_recurrence(xproj_ref, bias_ref, whh_ref, h_scr, o_scr, tl)
    o_ref[...] = chunk.astype(o_ref.dtype)
    bn, tc, hp = chunk.shape
    hflat = chunk.reshape(bn * tc, hp).astype(jnp.bfloat16)
    p = jnp.dot(hflat, w1_ref[...], preferred_element_type=jnp.float32) + b1_ref[...]
    pred_ref[...] = p.reshape(bn, tc, -1).astype(pred_ref.dtype)


def rnn_forward(xproj, bias, w_hh, head=None, *, mlp=True):
    """xproj: (Np, L, Hp) bf16; bias: (Np, Hp) f32; head: None | (w1,b1) | (w1,b1,w2,b2)."""
    n_p, seq_len, h_p = xproj.shape

    # time chunk length (keep it a divisor of L where possible -> no time pad)
    if seq_len <= 16:
        tl, lp = seq_len, seq_len
    elif seq_len % 16 == 0:
        tl, lp = 16, seq_len
    elif seq_len % 8 == 0:
        tl, lp = 8, seq_len
    else:
        tl = 8
        lp = _round_up(seq_len, tl)
        xproj = jnp.pad(xproj, ((0, 0), (0, lp - seq_len), (0, 0)))  # rare fallback

    # batch tile (n_p is a multiple of 8 by construction)
    bn = 32 if n_p % 32 == 0 else (16 if n_p % 16 == 0 else _SUBLANE)
    bn = min(bn, n_p)

    grid = (n_p // bn, lp // tl)
    common_in = [
        pl.BlockSpec((bn, tl, h_p), lambda b, t: (b, t, 0)),
        pl.BlockSpec((bn, h_p), lambda b, t: (b, 0)),
        pl.BlockSpec(w_hh.shape, lambda b, t: (0, 0)),
    ]
    scratch = [pltpu.VMEM((bn, h_p), jnp.float32),        # hidden state
               pltpu.VMEM((bn, tl, h_p), jnp.float32)]    # chunk hidden block
    out_block = pl.BlockSpec((bn, tl, h_p), lambda b, t: (b, t, 0))
    cparams = pltpu.CompilerParams(
        dimension_semantics=("parallel", "arbitrary"),
        vmem_limit_bytes=_VMEM_LIMIT,
    )

    if head is None:
        out = pl.pallas_call(
            functools.partial(_rnn_kernel, tl=tl),
            out_shape=jax.ShapeDtypeStruct((n_p, lp, h_p), jnp.bfloat16),
            grid_spec=pltpu.PrefetchScalarGridSpec(
                num_scalar_prefetch=0, grid=grid,
                in_specs=common_in, out_specs=out_block,
                scratch_shapes=scratch),
            compiler_params=cparams,
        )(xproj, bias, w_hh)
        return out[:, :seq_len, :], None

    if mlp:
        w1, b1, w2, b2 = head
        kernel = functools.partial(_rnn_mlp_kernel, tl=tl)
        in_specs = common_in + [
            pl.BlockSpec(w1.shape, lambda b, t: (0, 0)),
            pl.BlockSpec(b1.shape, lambda b, t: (0, 0)),
            pl.BlockSpec(w2.shape, lambda b, t: (0, 0)),
            pl.BlockSpec(b2.shape, lambda b, t: (0, 0)),
        ]
        args = (xproj, bias, w_hh, w1, b1, w2, b2)
    else:
        w1, b1 = head
        kernel = functools.partial(_rnn_lin_kernel, tl=tl)
        in_specs = common_in + [
            pl.BlockSpec(w1.shape, lambda b, t: (0, 0)),
            pl.BlockSpec(b1.shape, lambda b, t: (0, 0)),
        ]
        args = (xproj, bias, w_hh, w1, b1)

    patient, pred = pl.pallas_call(
        kernel,
        out_shape=[jax.ShapeDtypeStruct((n_p, lp, h_p), jnp.bfloat16),
                   jax.ShapeDtypeStruct((n_p, lp, h_p), jnp.bfloat16)],
        grid_spec=pltpu.PrefetchScalarGridSpec(
            num_scalar_prefetch=0, grid=grid,
            in_specs=in_specs, out_specs=[out_block, out_block],
            scratch_shapes=scratch),
        compiler_params=cparams,
    )(*args)
    return patient[:, :seq_len, :], pred[:, :seq_len, :]


# --------------------------------------------------------------------------
# Model wrapper (padded parameters + forward glue)
# --------------------------------------------------------------------------
class PredictionRNNModelPallas:
    def __init__(self, key, *, table_feat=16, dem_feat=8, ts_out=32,
                 pat_hidden=32, prediction_steps=(1,), predictor=True,
                 predictor_mlp=True, mlp_hidden=2 * 128):
        if len(prediction_steps) == 0:
            raise ValueError
        if len(prediction_steps) > 1:
            raise NotImplementedError
        if not predictor:
            pat_hidden = ts_out     # matches reference: pat_hidden = encoder.out_size
        self.prediction_steps = list(prediction_steps)
        self.predictor = predictor
        self.predictor_mlp = predictor_mlp
        self.ts_out = ts_out
        self.pat_hidden = pat_hidden

        self.ts_p = _round_up(ts_out, _LANE)
        self.h_p = _round_up(pat_hidden, _LANE)
        mlp_p = _round_up(mlp_hidden, _LANE)

        ks = jax.random.split(key, 8)
        s = 0.1

        def padded(k, rows_log, cols_log, rows_p, cols_p):
            # logical weights, zero-padded to lane-aligned widths, bf16 for MXU
            w = s * jax.random.normal(k, (rows_log, cols_log), dtype=jnp.float32)
            w = jnp.pad(w, ((0, rows_p - rows_log), (0, cols_p - cols_log)))
            return w.astype(jnp.bfloat16)

        # timestep encoder: Linear(C -> ts_out) + ReLU
        self.w_ts = padded(ks[0], table_feat, ts_out, table_feat, self.ts_p)
        self.b_ts = jnp.zeros((1, self.ts_p), jnp.float32)

        # patient RNN: h_t = tanh(enc_t@W_ih_ts + dem@W_ih_dem + h@W_hh + b)
        self.w_ih_ts = padded(ks[1], ts_out, pat_hidden, self.ts_p, self.h_p)
        self.w_ih_dem = padded(ks[2], dem_feat, pat_hidden, dem_feat, self.h_p)
        self.w_hh = padded(ks[3], pat_hidden, pat_hidden, self.h_p, self.h_p)
        self.b_h = jnp.zeros((1, self.h_p), jnp.float32)

        if predictor:
            if predictor_mlp:
                self.w1 = padded(ks[4], pat_hidden, mlp_hidden, self.h_p, mlp_p)
                self.b1 = jnp.zeros((1, mlp_p), jnp.float32)
                self.w2 = padded(ks[5], mlp_hidden, pat_hidden, mlp_p, self.h_p)
                self.b2 = jnp.zeros((1, self.h_p), jnp.float32)
            else:
                self.w1 = padded(ks[4], pat_hidden, pat_hidden, self.h_p, self.h_p)
                self.b1 = jnp.zeros((1, self.h_p), jnp.float32)

    def __call__(self, dem, *tables):
        n = dem.shape[0]
        # pad batch once to a full sublane group: every downstream row count
        # (N*L, RNN batch tiles) is then a multiple of 8 -> no further pads.
        n_p = max(_round_up(n, _SUBLANE), _SUBLANE)
        dem_p = _pad_rows(dem, n_p)

        # ---- timestep encoder fused with the RNN input projection (table 0) -
        t0 = tables[0]
        _, seq_len, c = t0.shape
        t0_p = _pad_rows(t0, n_p)
        enc0, proj0 = encode_project(t0_p.reshape(n_p * seq_len, c),
                                     self.w_ts, self.b_ts, self.w_ih_ts)
        timesteps = [enc0.reshape(n_p, seq_len, self.ts_p)[:n, :, :self.ts_out]]
        xproj = proj0.reshape(n_p, seq_len, self.h_p)      # (Np, L, Hp), batch-major

        # TODO(synk): the reference TimestepEncoder/PatientRNNEncoder table
        # aggregation is unknown; extra tables are encoded (one fused call)
        # only for extra['timesteps'] and do not feed the RNN.
        if len(tables) > 1:
            rows = [t.reshape(-1, t.shape[-1]) for t in tables[1:]]
            enc_cat = encode_only(jnp.concatenate(rows, axis=0),
                                  self.w_ts, self.b_ts)
            off = 0
            for t in tables[1:]:
                nt, lt, _ = t.shape
                timesteps.append(
                    enc_cat[off:off + nt * lt]
                    .reshape(nt, lt, self.ts_p)[:n, :, :self.ts_out])
                off += nt * lt
        timesteps = tuple(timesteps)

        # ---- dem projection computed once, off the serial RNN chain ---------
        bias = dem_bias(dem_p, self.w_ih_dem, self.b_h)     # (Np, Hp) f32

        # ---- patient RNN encoder (+ fused predictor head) --------------------
        k = self.prediction_steps[0]
        if self.predictor:
            head = ((self.w1, self.b1, self.w2, self.b2) if self.predictor_mlp
                    else (self.w1, self.b1))
            patient_p, pred_p = rnn_forward(xproj, bias, self.w_hh, head,
                                            mlp=self.predictor_mlp)
            patient_timesteps = patient_p[:n, :, :self.pat_hidden]
            predicted_ts = pred_p[:n, :seq_len - k, :self.pat_hidden]
        else:
            patient_p, _ = rnn_forward(xproj, bias, self.w_hh, None)
            patient_timesteps = patient_p[:n, :, :self.pat_hidden]
            predicted_ts = patient_timesteps[:, :-k]

        extra = {'patient': patient_timesteps, 'timesteps': timesteps}
        # NOTE: matches the PyTorch forward verbatim — 'step' drops the last k
        # timesteps (axis 1); 'step_y' = patient_timesteps[k:] slices axis 0
        # (batch), exactly as the reference indexing does.
        y_pred = {'step': predicted_ts, 'step_y': patient_timesteps[k:]}
        return y_pred, extra


if __name__ == "__main__":
    key = jax.random.PRNGKey(0)
    k_model, k_dem, k_tab = jax.random.split(key, 3)

    N, L, C, C_DEM = 2, 8, 16, 8
    model = PredictionRNNModelPallas(
        k_model, table_feat=C, dem_feat=C_DEM, ts_out=32, pat_hidden=32,
        prediction_steps=(1,), predictor=True, predictor_mlp=True)

    dem = jax.random.normal(k_dem, (N, C_DEM), dtype=jnp.float32)
    table = jax.random.normal(k_tab, (N, L, C), dtype=jnp.float32)

    y_pred, extra = model(dem, table)
    jax.block_until_ready((y_pred, extra))

    assert y_pred['step'].shape == (N, L - 1, 32)
    assert y_pred['step_y'].shape == (N - 1, L, 32)
    assert extra['patient'].shape == (N, L, 32)
    assert extra['timesteps'][0].shape == (N, L, 32)
    print("KERNEL_OK")
</pallas_src>

<mosaic_0001>
module attributes {stable_mosaic.version = 11 : i64} {
  func.func @_encode_project_kernel(%arg0: i32, %arg1: memref<64x16xf32, #tpu.memory_space<vmem>>, %arg2: memref<16x128xbf16, #tpu.memory_space<vmem>>, %arg3: memref<1x128xf32, #tpu.memory_space<vmem>>, %arg4: memref<128x128xbf16, #tpu.memory_space<vmem>>, %arg5: memref<64x128xbf16, #tpu.memory_space<vmem>>, %arg6: memref<64x128xbf16, #tpu.memory_space<vmem>>) attributes {dimension_semantics = [#tpu.dimension_semantics<parallel>], iteration_bounds = array<i64: 1>, scalar_prefetch = 0 : i64, scratch_operands = 0 : i64, tpu.core_type = #tpu.core_type<tc>, window_params = [{transform_indices = @transform_0, window_bounds = array<i64: 64, 16>}, {pipeline_mode = #tpu.pipeline_mode<synchronous>, transform_indices = @transform_1, window_bounds = array<i64: 16, 128>}, {pipeline_mode = #tpu.pipeline_mode<synchronous>, transform_indices = @transform_2, window_bounds = array<i64: 1, 128>}, {pipeline_mode = #tpu.pipeline_mode<synchronous>, transform_indices = @transform_3, window_bounds = array<i64: 128, 128>}, {transform_indices = @transform_4, window_bounds = array<i64: 64, 128>}, {transform_indices = @transform_5, window_bounds = array<i64: 64, 128>}]} {
    %c0 = arith.constant 0 : index
    %c0_0 = arith.constant 0 : index
    %0 = vector.load %arg1[%c0, %c0_0] : memref<64x16xf32, #tpu.memory_space<vmem>>, vector<64x16xf32>
    %1 = arith.truncf %0 : vector<64x16xf32> to vector<64x16xbf16>
    %c0_1 = arith.constant 0 : index
    %c0_2 = arith.constant 0 : index
    %2 = vector.load %arg2[%c0_1, %c0_2] : memref<16x128xbf16, #tpu.memory_space<vmem>>, vector<16x128xbf16>
    %cst = arith.constant dense<0.000000e+00> : vector<64x128xf32>
    %3 = tpu.matmul %1, %2, %cst {dimension_numbers = #tpu.dot_dimension_numbers<[1], [0], [0], [1], [0, 0, 1, 1], [], []>} : vector<64x16xbf16>, vector<16x128xbf16>, vector<64x128xf32> -> vector<64x128xf32>
    %c0_3 = arith.constant 0 : index
    %c0_4 = arith.constant 0 : index
    %4 = vector.load %arg3[%c0_3, %c0_4] : memref<1x128xf32, #tpu.memory_space<vmem>>, vector<1x128xf32>
    %5 = vector.broadcast %4 : vector<1x128xf32> to vector<64x128xf32>
    %6 = arith.addf %3, %5 : vector<64x128xf32>
    %cst_5 = arith.constant 0.000000e+00 : f32
    %7 = vector.broadcast %cst_5 : f32 to vector<64x128xf32>
    %8 = arith.maximumf %6, %7 : vector<64x128xf32>
    %9 = arith.truncf %8 : vector<64x128xf32> to vector<64x128xbf16>
    %c0_6 = arith.constant 0 : index
    %c0_7 = arith.constant 0 : index
    %10 = vector.load %arg5[%c0_6, %c0_7] : memref<64x128xbf16, #tpu.memory_space<vmem>>, vector<64x128xbf16>
    tpu.vector_store %arg5[%c0_6, %c0_7], %9 {strides = array<i32>} : memref<64x128xbf16, #tpu.memory_space<vmem>>, vector<64x128xbf16>,
    %11 = arith.truncf %8 : vector<64x128xf32> to vector<64x128xbf16>
    %c0_8 = arith.constant 0 : index
    %c0_9 = arith.constant 0 : index
    %12 = vector.load %arg4[%c0_8, %c0_9] : memref<128x128xbf16, #tpu.memory_space<vmem>>, vector<128x128xbf16>
    %cst_10 = arith.constant dense<0.000000e+00> : vector<64x128xf32>
    %13 = tpu.matmul %11, %12, %cst_10 {dimension_numbers = #tpu.dot_dimension_numbers<[1], [0], [0], [1], [0, 0, 1, 1], [], []>} : vector<64x128xbf16>, vector<128x128xbf16>, vector<64x128xf32> -> vector<64x128xf32>
    %14 = arith.truncf %13 : vector<64x128xf32> to vector<64x128xbf16>
    %c0_11 = arith.constant 0 : index
    %c0_12 = arith.constant 0 : index
    %15 = vector.load %arg6[%c0_11, %c0_12] : memref<64x128xbf16, #tpu.memory_space<vmem>>, vector<64x128xbf16>
    tpu.vector_store %arg6[%c0_11, %c0_12], %14 {strides = array<i32>} : memref<64x128xbf16, #tpu.memory_space<vmem>>, vector<64x128xbf16>,
    return
  }
  func.func @transform_0(%arg0: i32) -> (i32, i32) {
    %c0_i32 = arith.constant 0 : i32
    %c0_i32_0 = arith.constant 0 : i32
    return %arg0, %c0_i32 : i32, i32
  }
  func.func @transform_1(%arg0: i32) -> (i32, i32) {
    %c0_i32 = arith.constant 0 : i32
    %c0_i32_0 = arith.constant 0 : i32
    %c0_i32_1 = arith.constant 0 : i32
    return %c0_i32, %c0_i32_0 : i32, i32
  }
  func.func @transform_2(%arg0: i32) -> (i32, i32) {
    %c0_i32 = arith.constant 0 : i32
    %c0_i32_0 = arith.constant 0 : i32
    %c0_i32_1 = arith.constant 0 : i32
    return %c0_i32, %c0_i32_0 : i32, i32
  }
  func.func @transform_3(%arg0: i32) -> (i32, i32) {
    %c0_i32 = arith.constant 0 : i32
    %c0_i32_0 = arith.constant 0 : i32
    %c0_i32_1 = arith.constant 0 : i32
    return %c0_i32, %c0_i32_0 : i32, i32
  }
  func.func @transform_4(%arg0: i32) -> (i32, i32) {
    %c0_i32 = arith.constant 0 : i32
    %c0_i32_0 = arith.constant 0 : i32
    return %arg0, %c0_i32 : i32, i32
  }
  func.func @transform_5(%arg0: i32) -> (i32, i32) {
    %c0_i32 = arith.constant 0 : i32
    %c0_i32_0 = arith.constant 0 : i32
    return %arg0, %c0_i32 : i32, i32
  }
}

</mosaic_0001>

<bundles_post_ra>
// kernel: tpu_custom_call.1
= control target key start
LH: loop header
LB: loop body
LE: loop exit
PB: predicated region body
PF: predicated region fallthrough
CT: control target
= control target key end

     0   :  { %11 = vsyncpa [#allocation3], 0  ;;  %vm49_vm0 = vcmask 130048   ;;  %s718_s0 = inlined_call_operand.vmem [shape: f32[64,16], index: 0, kind: input, shape index: {}]   ;;  %s719_s1 = inlined_call_operand.vmem [shape: bf16[16,128], index: 1, kind: input, shape index: {}]   ;;  %s720_s2 = inlined_call_operand.vmem [shape: f32[1,128], index: 2, kind: input, shape index: {}]   ;;  %s721_s3 = inlined_call_operand.vmem [shape: bf16[128,128], index: 3, kind: input, shape index: {}]   ;;  %s722_s4 = inlined_call_operand.hbm [shape: bf16[64,128], index: 4, kind: output, shape index: {0}]   ;;  %s723_s5 = inlined_call_operand.hbm [shape: bf16[64,128], index: 5, kind: output, shape index: {1}]  }
   0x1   :  { %v539_v0 = vld [vmem:[%s719_s1] sm:$0xff]   ;;  %v23_v2 = vld [vmem:[%s718_s0 + $0x8] sm:$0xff]  ;;  %v24_v3 = vld [vmem:[%s718_s0 + $0x10] sm:$0xff] }
   0x2   :  { %v22_v1 = vld [vmem:[%s718_s0] sm:$0xff]  ;;  %485 = vmatprep.subr.bf16.mxu0 %v539_v0  ;;  %v25_v5 = vld [vmem:[%s718_s0 + $0x18] sm:$0xff]  ;;  %v27_v7 = vld [vmem:[%s718_s0 + $0x28] sm:$0xff] }
   0x3   :  { %v30_v4 = vpack.c.bf16 %v23_v2, %v22_v1  ;;  %v26_v6 = vld [vmem:[%s718_s0 + $0x20] sm:$0xff]  ;;  %486 = vmatpush3.bf16.msra.mxu0 %v539_v0  ;;  %v31_v8 = vpack.c.bf16 %v25_v5, %v24_v3  ;;  %v541_v11 = vld [vmem:[%s721_s3 + $0x8] sm:$0xff]   ;;  %v28_v12 = vld [vmem:[%s718_s0 + $0x30] sm:$0xff] }
   0x4   :  { %v32_v9 = vpack.c.bf16 %v27_v7, %v26_v6  ;;  %v540_v10 = vld [vmem:[%s721_s3] sm:$0xff]   ;;  %v29_v13 = vld [vmem:[%s718_s0 + $0x38] sm:$0xff]  ;;  %v542_v14 = vld [vmem:[%s721_s3 + $0x10] sm:$0xff]  }
   0x5   :  { %487 = vmatprep.mubr.msk.bf16.mxu0 %vm49_vm0, %v30_v4  ;;  %495 = vmatprep.subr.bf16.mxu0 %v540_v10  ;;  %v33_v15 = vpack.c.bf16 %v29_v13, %v28_v12 }
   0x6   :  { %488 = vmatmul.mubr.msk.bf16.vlgmr.msra.gmra.mrb[0].mxu0 %vm49_vm0, %v31_v8  ;;  %519 = vmatprep.subr.bf16.mxu1 %v540_v10 }
   0x7   :  { %491 = vmatprep.mubr.msk.bf16.mxu0 %vm49_vm0, %v32_v9  ;;  %496 = vmatpush3.bf16.msra.mxu0 %v540_v10 }
   0x8   :  { %497 = vmatprep.subr.bf16.mxu0 %v541_v11  ;;  %527 = vmatpush3.bf16.msra.mxu1 %v540_v10 }
   0x9   :  { %520 = vmatprep.subr.bf16.mxu1 %v541_v11 }
   0xb   :  { %498 = vmatpush3.bf16.msra.mxu0 %v541_v11 }
   0xc   :  { %12 = vsyncpa [#allocation5], 0  ;;  %499 = vmatprep.subr.bf16.mxu0 %v542_v14  ;;  %v543_v16 = vld [vmem:[%s721_s3 + $0x18] sm:$0xff]   ;;  %528 = vmatpush3.bf16.msra.mxu1 %v541_v11  ;;  %v544_v17 = vld [vmem:[%s721_s3 + $0x20] sm:$0xff]  }
   0xd   :  { %521 = vmatprep.subr.bf16.mxu1 %v542_v14  ;;  %v545_v18 = vld [vmem:[%s721_s3 + $0x28] sm:$0xff]   ;;  %v546_v19 = vld [vmem:[%s721_s3 + $0x30] sm:$0xff]   ;;  %v547_v20 = vld [vmem:[%s721_s3 + $0x38] sm:$0xff]  }
   0xe   :  { %492 = vmatmul.mubr.msk.bf16.gmra.mrb[4].mxu0 %vm49_vm0, %v33_v15  ;;  %v376_v21 = vld [vmem:[%s720_s2] ss:$0 sm:$0xff]  ;;  %s596_s2 = smov [#allocation2]  }
   0xf   :  { %500 = vmatpush3.bf16.msra.mxu0 %v542_v14  ;;  %s349_s3 = sshll.u32 %s596_s2, 4  ;;  %s350_s3 = int_to_ptr.vmem [resolvable:$true] %s349_s3 }
  0x10   :  { %501 = vmatprep.subr.bf16.mxu0 %v543_v16  ;;  %529 = vmatpush3.bf16.msra.mxu1 %v542_v14  ;;  %s548_s27 = scalar_lea.vmem %s350_s3, 512  ;;  %p553_p1 = scmp.lt.s32.totalorder %s350_s3, %s350_s3 }
  0x11   :  { %522 = vmatprep.subr.bf16.mxu1 %v543_v16  ;;  %p549_p0 = scmp.ne.s32.totalorder %s350_s3, %s548_s27  ;;  %p554_p2 = scmp.lt.s32.totalorder %s548_s27, %s548_s27 }
  0x13   :  { %502 = vmatpush3.bf16.msra.mxu0 %v543_v16  ;;  %p555_p3 = por %p554_p2, %p553_p1 }
  0x14   :  { %503 = vmatprep.subr.bf16.mxu0 %v544_v17  ;;  %530 = vmatpush3.bf16.msra.mxu1 %v543_v16 }
  0x15   :  { %523 = vmatprep.subr.bf16.mxu1 %v544_v17  ;;  %p556_p4 = pnand %p555_p3, %p549_p0 }
  0x17   :  { %504 = vmatpush3.bf16.msra.mxu0 %v544_v17 }
  0x18   :  { %505 = vmatprep.subr.bf16.mxu0 %v545_v18  ;;  %531 = vmatpush3.bf16.msra.mxu1 %v544_v17 }
  0x19   :  { %524 = vmatprep.subr.bf16.mxu1 %v545_v18 }
  0x1b   :  { %506 = vmatpush3.bf16.msra.mxu0 %v545_v18 }
  0x1c   :  { %532 = vmatpush3.bf16.msra.mxu1 %v545_v18  ;;  %507 = vmatprep.subr.bf16.mxu0 %v546_v19 }
  0x1d   :  { %525 = vmatprep.subr.bf16.mxu1 %v546_v19 }
  0x1f   :  { %508 = vmatpush3.bf16.msra.mxu0 %v546_v19 }
  0x20   :  { %533 = vmatpush3.bf16.msra.mxu1 %v546_v19  ;;  %509 = vmatprep.subr.bf16.mxu0 %v547_v20 }
  0x21   :  { %526 = vmatprep.subr.bf16.mxu1 %v547_v20 }
  0x23   :  { %510 = vmatpush3.bf16.msra.mxu0 %v547_v20 }
  0x24   :  { %534 = vmatpush3.bf16.msra.mxu1 %v547_v20 }
  0xd9   :  { %v489_v22 = vpop.f32.mrb[0].mxu0 }
  0xda   :  { %v105_v23 = vadd.f32 %v489_v22, %v376_v21  ;;  %v96_v24 = vpop.f32.mrb[1].mxu0 }
  0xdb   :  { %v97_v25 = vadd.f32 %v376_v21, %v96_v24  ;;  %v490_v26 = vpop.f32.mrb[2].mxu0 }
  0xdc   :  { %v108_v27 = vadd.f32 %v490_v26, %v376_v21  ;;  %v99_v28 = vpop.f32.mrb[3].mxu0  ;;  %v129_v30 = vmax.f32 %v105_v23, 0.0 }
  0xdd   :  { %v100_v29 = vadd.f32 %v376_v21, %v99_v28  ;;  %v127_v32 = vmax.f32 %v97_v25, 0.0 }
  0xde   :  { %v130_v31 = vmax.f32 %v108_v27, 0.0 }
  0xdf   :  { %v128_v33 = vmax.f32 %v100_v29, 0.0 }
  0xe0   :  { %v136_v34 = vpack.c.bf16 %v130_v31, %v129_v30 }
  0xe1   :  { %v135_v35 = vpack.c.bf16 %v128_v33, %v127_v32  ;;  %v493_v36 = vpop.f32.mrb[4].mxu0 }
  0xe2   :  { %462 = vst [vmem:[#allocation2 + $0x8] sm:$0xff] %v136_v34   ;;  %v121_v37 = vadd.f32 %v493_v36, %v376_v21  ;;  %v112_v38 = vpop.f32.mrb[5].mxu0 }
  0xe3   :  { %426 = vst [vmem:[#allocation2] sm:$0xff] %v135_v35   ;;  %v113_v39 = vadd.f32 %v376_v21, %v112_v38  ;;  %v494_v40 = vpop.f32.mrb[6].mxu0  ;;  %511 = vmatprep.mubr.bf16.mxu0 %v135_v35 }
  0xe4   :  { %v124_v41 = vadd.f32 %v494_v40, %v376_v21  ;;  %v115_v42 = vpop.f32.mrb[7].mxu0  ;;  %512 = vmatmul.mubr.bf16.vlgmr.msra.gmra.mrb[8].mxu0 %v136_v34  ;;  %v133_v44 = vmax.f32 %v121_v37, 0.0 }
  0xe5   :  { %v116_v43 = vadd.f32 %v376_v21, %v115_v42  ;;  %v131_v46 = vmax.f32 %v113_v39, 0.0 }
  0xe6   :  { %v134_v45 = vmax.f32 %v124_v41, 0.0 }
  0xe7   :  { %v132_v47 = vmax.f32 %v116_v43, 0.0 }
  0xe8   :  { %v138_v48 = vpack.c.bf16 %v134_v45, %v133_v44 }
  0xe9   :  { %v137_v49 = vpack.c.bf16 %v132_v47, %v131_v46 }
  0xea   :  { %464 = vst [vmem:[#allocation2 + $0x18] sm:$0xff] %v138_v48  }
  0xeb   :  { %463 = vst [vmem:[#allocation2 + $0x10] sm:$0xff] %v137_v49   ;;  %515 = vmatprep.mubr.bf16.mxu1 %v137_v49 }
  0xec   :  { %516 = vmatmul.mubr.bf16.vlgmr.msra.gmra.mrb[0].mxu1 %v138_v48 }
  0xed   :  { %559 = shalt.err (!%p556_p4)
}
  0xee   :  { %s560_s29 = scalar_lea.hbm %s722_s4, 512 }
  0xef   :  { %p561_p5 = scmp.ne.s32.totalorder %s722_s4, %s560_s29  ;;  %p564_p6 = scmp.lt.u32.totalorder %s560_s29, %s722_s4 }
  0xf1   :  { %p566_p7 = pnand %p564_p6, %p561_p5 }
  0xf3   :  { %569 = shalt.err (!%p566_p7)
}
  0xf4   :  { %s597_s9 = smov 64   ;;  %s598_s10 = smov 4  }
  0xf5   :  { %355 = dma.vmem_to_hbm [thread:$0]  %s350_s3, 512, %s722_s4, [#allocation3], %s597_s9, %s597_s9, %s598_s10  }
  0xf6   :  { %s599_s13 = smov [#allocation4]  }
  0xf7   :  { %s361_s14 = sshll.u32 %s599_s13, 4  ;;  %s362_s14 = int_to_ptr.vmem [resolvable:$true] %s361_s14 }
  0xf8   :  { %s570_s4 = scalar_lea.vmem %s362_s14, 512  ;;  %p575_p9 = scmp.lt.s32.totalorder %s362_s14, %s362_s14 }
  0xf9   :  { %p571_p8 = scmp.ne.s32.totalorder %s362_s14, %s570_s4  ;;  %p576_p10 = scmp.lt.s32.totalorder %s570_s4, %s570_s4 }
  0xfb   :  { %p577_p11 = por %p576_p10, %p575_p9 }
  0xfd   :  { %p578_p12 = pnand %p577_p11, %p571_p8 }
 0x1b7   :  { %v513_v50 = vpop.f32.mrb[8].mxu0 }
 0x1b8   :  { %v273_v51 = vpop.f32.mrb[9].mxu0 }
 0x1b9   :  { %v514_v52 = vpop.f32.mrb[10].mxu0 }
 0x1ba   :  { %v450_v53 = vpack.c.bf16 %v514_v52, %v513_v50  ;;  %v276_v54 = vpop.f32.mrb[11].mxu0 }
 0x1bb   :  { %v445_v55 = vpack.c.bf16 %v276_v54, %v273_v51 }
 0x1bc   :  { %465 = vst [vmem:[#allocation4 + $0x8] sm:$0xff] %v450_v53  }
 0x1bd   :  { %446 = vst [vmem:[#allocation4] sm:$0xff] %v445_v55  }
 0x1bf   :  { %v517_v56 = vpop.f32.mrb[0].mxu1 }
 0x1c0   :  { %v289_v57 = vpop.f32.mrb[1].mxu1 }
 0x1c1   :  { %v518_v58 = vpop.f32.mrb[2].mxu1 }
 0x1c2   :  { %v460_v59 = vpack.c.bf16 %v518_v58, %v517_v56  ;;  %v292_v60 = vpop.f32.mrb[3].mxu1 }
 0x1c3   :  { %v455_v61 = vpack.c.bf16 %v292_v60, %v289_v57 }
 0x1c4   :  { %467 = vst [vmem:[#allocation4 + $0x18] sm:$0xff] %v460_v59  }
 0x1c5   :  { %466 = vst [vmem:[#allocation4 + $0x10] sm:$0xff] %v455_v61  }
 0x1c6   :  { %581 = shalt.err (!%p578_p12)
}
 0x1c7   :  { %s582_s17 = scalar_lea.hbm %s723_s5, 512 }
 0x1c8   :  { %p583_p13 = scmp.ne.s32.totalorder %s723_s5, %s582_s17  ;;  %p586_p0 = scmp.lt.u32.totalorder %s582_s17, %s723_s5 }
 0x1ca   :  { %p588_p1 = pnand %p586_p0, %p583_p13 }
 0x1cc   :  { %591 = shalt.err (!%p588_p1)
}
 0x1cd   :  { %367 = dma.vmem_to_hbm [thread:$0]  %s362_s14, 512, %s723_s5, [#allocation5], %s597_s9, %s597_s9, %s598_s10  }
 0x1ce   :  { %592 = dma.done.wait [#allocation3], 512  }
 0x1cf   :  { %593 = vsyncadd [#allocation3], 4294966784 }
 0x1d0   :  { %594 = dma.done.wait [#allocation5], 512  }
 0x1d1   :  { %595 = vsyncadd [#allocation5], 4294966784 }
 0x1d2   :  { %374 = vsyncpa [#allocation3], 1 }
 0x1d3   :  { %375 = vsyncpa [#allocation5], 1 }

</bundles_post_ra>
